<compile_context>
chip_gen: v5e
topology: v5e:2x2
jax: 0.10.0
libtpu: 0.0.40
codegen_flags: <defaults>
</compile_context>

<pallas_src>
import functools

import jax
import jax.numpy as jnp
from jax.experimental import pallas as pl
from jax.experimental.pallas import tpu as pltpu


# Per-input-block budget in *input-dtype* bytes, and the scoped-VMEM limit.
# 3 inputs x 2 pipeline buffers x 4 MiB = 24 MiB of double-buffered DMA
# windows, comfortably under the 48 MiB limit on every generation.
_BLOCK_BUDGET_BYTES = 4 * 1024 * 1024
_VMEM_LIMIT_BYTES = 48 * 1024 * 1024


def _round_up(x, m):
    return ((x + m - 1) // m) * m


def _rowloss_kernel(a_ref, p_ref, n_ref, out_ref, *, margin):
    """Full feature dim per block: single fused reduce, hinge applied in place."""
    a = a_ref[...].astype(jnp.float32)
    p = p_ref[...].astype(jnp.float32)
    n = n_ref[...].astype(jnp.float32)
    # Fused: one cross-lane (XLU) reduce instead of two.
    diff = (a - p) ** 2 - (a - n) ** 2
    row = jnp.sum(diff, axis=1, keepdims=True)          # (TB, 1)
    out_ref[...] = jnp.maximum(row + margin, 0.0)


def _rowloss_acc_kernel(a_ref, p_ref, n_ref, out_ref, *, margin, d_total, td):
    """Fallback for extremely wide embeddings: feature axis tiled + accumulated."""
    d = pl.program_id(1)
    a = a_ref[...].astype(jnp.float32)
    p = p_ref[...].astype(jnp.float32)
    n = n_ref[...].astype(jnp.float32)
    diff = (a - p) ** 2 - (a - n) ** 2
    if d_total % td != 0:
        # Ragged last feature block: zero lanes past the real feature dim
        # (edge blocks on the reduction axis otherwise read unspecified data).
        col = jax.lax.broadcasted_iota(jnp.int32, diff.shape, 1) + d * td
        diff = jnp.where(col < d_total, diff, 0.0)
    partial = jnp.sum(diff, axis=1, keepdims=True)       # (TB, 1)

    @pl.when(d == 0)
    def _():
        out_ref[...] = jnp.zeros_like(out_ref)

    out_ref[...] += partial

    @pl.when(d == pl.num_programs(1) - 1)
    def _():
        # Hinge applied per-row only once the full feature reduction is done.
        out_ref[...] = jnp.maximum(out_ref[...] + margin, 0.0)


def triplet_loss(anchor, positive, negative, margin=0.2):
    """Pallas TPU implementation of TripletLoss.forward. Returns a scalar f32."""
    assert anchor.shape == positive.shape == negative.shape
    assert anchor.ndim == 2, "expected (B, D) embeddings"
    B, D = anchor.shape
    itemsize = anchor.dtype.itemsize
    margin = float(margin)

    cost = pl.CostEstimate(
        flops=5 * B * D,
        transcendentals=0,
        bytes_accessed=3 * B * D * itemsize + 4 * B,
    )

    rows_per_block = max(1, _BLOCK_BUDGET_BYTES // max(1, D * itemsize))

    if rows_per_block >= 8:
        # --- Preferred path: full-D blocks, 1-D grid over batch tiles. ---
        # TD = D is legal for any D (full array extent), so no feature padding.
        TD = D
        TB = min((rows_per_block // 8) * 8, _round_up(B, 8))
        nb = pl.cdiv(B, TB)
        kernel = functools.partial(_rowloss_kernel, margin=margin)
        grid = (nb,)
        in_spec = pl.BlockSpec((TB, TD), lambda i: (i, 0))
        out_spec = pl.BlockSpec((TB, 1), lambda i: (i, 0))
        dims = ("parallel",)
    else:
        # --- Fallback: embeddings so wide that even 8 rows blow the budget. ---
        TB = 8
        lanes = (_BLOCK_BUDGET_BYTES // (TB * itemsize)) // 128 * 128
        TD = max(128, min(lanes, _round_up(D, 128)))
        nb = pl.cdiv(B, TB)
        nd = pl.cdiv(D, TD)
        kernel = functools.partial(
            _rowloss_acc_kernel, margin=margin, d_total=D, td=TD)
        grid = (nb, nd)
        in_spec = pl.BlockSpec((TB, TD), lambda i, d: (i, d))
        out_spec = pl.BlockSpec((TB, 1), lambda i, d: (i, 0))  # resident over d
        dims = ("parallel", "arbitrary")

    # Output is padded up to nb*TB rows (garbage tail rows from ragged batch
    # tiles land there and are sliced off below); inputs are NOT padded.
    per_row = pl.pallas_call(
        kernel,
        out_shape=jax.ShapeDtypeStruct((nb * TB, 1), jnp.float32),
        grid_spec=pltpu.PrefetchScalarGridSpec(
            num_scalar_prefetch=0,
            grid=grid,
            in_specs=[in_spec, in_spec, in_spec],
            out_specs=out_spec,
        ),
        compiler_params=pltpu.CompilerParams(
            dimension_semantics=dims,
            vmem_limit_bytes=_VMEM_LIMIT_BYTES,
        ),
        cost_estimate=cost,
    )(anchor, positive, negative)

    # Final mean over the real batch (discards any garbage tail rows).
    return jnp.sum(per_row[:B, 0]) / jnp.float32(B)


def _reference(anchor, positive, negative, margin=0.2):
    dp = jnp.sum((anchor - positive) ** 2, axis=1)
    dn = jnp.sum((anchor - negative) ** 2, axis=1)
    return jnp.mean(jnp.maximum(dp - dn + margin, 0.0))


if __name__ == "__main__":
    key = jax.random.PRNGKey(0)
    k_a, k_p, k_n = jax.random.split(key, 3)

    B, D = 8, 32  # small embedding batch
    anchor = jax.random.normal(k_a, (B, D), dtype=jnp.float32)
    positive = jax.random.normal(k_p, (B, D), dtype=jnp.float32)
    negative = jax.random.normal(k_n, (B, D), dtype=jnp.float32)

    out = triplet_loss(anchor, positive, negative, margin=0.2)
    out = jax.block_until_ready(out)

    ref = _reference(anchor, positive, negative, margin=0.2)
    assert jnp.allclose(out, ref, rtol=1e-5, atol=1e-5), (out, ref)

    print("KERNEL_OK")
</pallas_src>

<mosaic_0001>
module attributes {stable_mosaic.version = 11 : i64} {
  func.func @_rowloss_kernel(%arg0: i32, %arg1: memref<8x32xf32, #tpu.memory_space<vmem>>, %arg2: memref<8x32xf32, #tpu.memory_space<vmem>>, %arg3: memref<8x32xf32, #tpu.memory_space<vmem>>, %arg4: memref<8x1xf32, #tpu.memory_space<vmem>>) attributes {dimension_semantics = [#tpu.dimension_semantics<parallel>], iteration_bounds = array<i64: 1>, scalar_prefetch = 0 : i64, scratch_operands = 0 : i64, tpu.core_type = #tpu.core_type<tc>, window_params = [{transform_indices = @transform_0, window_bounds = array<i64: 8, 32>}, {transform_indices = @transform_1, window_bounds = array<i64: 8, 32>}, {transform_indices = @transform_2, window_bounds = array<i64: 8, 32>}, {transform_indices = @transform_3, window_bounds = array<i64: 8, 1>}]} {
    %c0 = arith.constant 0 : index
    %c0_0 = arith.constant 0 : index
    %0 = vector.load %arg1[%c0, %c0_0] : memref<8x32xf32, #tpu.memory_space<vmem>>, vector<8x32xf32>
    %c0_1 = arith.constant 0 : index
    %c0_2 = arith.constant 0 : index
    %1 = vector.load %arg2[%c0_1, %c0_2] : memref<8x32xf32, #tpu.memory_space<vmem>>, vector<8x32xf32>
    %c0_3 = arith.constant 0 : index
    %c0_4 = arith.constant 0 : index
    %2 = vector.load %arg3[%c0_3, %c0_4] : memref<8x32xf32, #tpu.memory_space<vmem>>, vector<8x32xf32>
    %3 = arith.subf %0, %1 : vector<8x32xf32>
    %4 = arith.mulf %3, %3 : vector<8x32xf32>
    %5 = arith.subf %0, %2 : vector<8x32xf32>
    %6 = arith.mulf %5, %5 : vector<8x32xf32>
    %7 = arith.subf %4, %6 : vector<8x32xf32>
    %cst = arith.constant dense<0.000000e+00> : vector<8xf32>
    %8 = vector.multi_reduction <add>, %7, %cst [1] : vector<8x32xf32> to vector<8xf32>
    %9 = vector.shape_cast %8 : vector<8xf32> to vector<8x1xf32>
    %cst_5 = arith.constant 2.000000e-01 : f32
    %10 = vector.broadcast %cst_5 : f32 to vector<8x1xf32>
    %11 = arith.addf %9, %10 : vector<8x1xf32>
    %cst_6 = arith.constant 0.000000e+00 : f32
    %12 = vector.broadcast %cst_6 : f32 to vector<8x1xf32>
    %13 = arith.maximumf %11, %12 : vector<8x1xf32>
    %c0_7 = arith.constant 0 : index
    %c0_8 = arith.constant 0 : index
    %14 = vector.load %arg4[%c0_7, %c0_8] : memref<8x1xf32, #tpu.memory_space<vmem>>, vector<8x1xf32>
    tpu.vector_store %arg4[%c0_7, %c0_8], %13 {strides = array<i32>} : memref<8x1xf32, #tpu.memory_space<vmem>>, vector<8x1xf32>,
    return
  }
  func.func @transform_0(%arg0: i32) -> (i32, i32) {
    %c0_i32 = arith.constant 0 : i32
    %c0_i32_0 = arith.constant 0 : i32
    return %arg0, %c0_i32 : i32, i32
  }
  func.func @transform_1(%arg0: i32) -> (i32, i32) {
    %c0_i32 = arith.constant 0 : i32
    %c0_i32_0 = arith.constant 0 : i32
    return %arg0, %c0_i32 : i32, i32
  }
  func.func @transform_2(%arg0: i32) -> (i32, i32) {
    %c0_i32 = arith.constant 0 : i32
    %c0_i32_0 = arith.constant 0 : i32
    return %arg0, %c0_i32 : i32, i32
  }
  func.func @transform_3(%arg0: i32) -> (i32, i32) {
    %c0_i32 = arith.constant 0 : i32
    %c0_i32_0 = arith.constant 0 : i32
    return %arg0, %c0_i32 : i32, i32
  }
}

</mosaic_0001>

<bundles_post_ra>
// kernel: tpu_custom_call.1
= control target key start
LH: loop header
LB: loop body
LE: loop exit
PB: predicated region body
PF: predicated region fallthrough
CT: control target
= control target key end

     0   :  { %8 = vsyncpa [#allocation3], 0  ;;  %s191_s0 = inlined_call_operand.hbm [shape: f32[8,32], index: 0, kind: input, shape index: {}]   ;;  %s192_s1 = inlined_call_operand.hbm [shape: f32[8,32], index: 1, kind: input, shape index: {}]   ;;  %s193_s2 = inlined_call_operand.hbm [shape: f32[8,32], index: 2, kind: input, shape index: {}]   ;;  %s194_s3 = inlined_call_operand.vmem [shape: f32[8,1], index: 3, kind: output, shape index: {}]  }
   0x1   :  { %9 = vsyncpa [#allocation5], 0  ;;  %s26_s14 = sshll.u32 %s192_s1, 4  ;;  %s156_s15 = smov [#allocation4]   ;;  %s27_s14 = int_to_ptr.hbm [resolvable:$true] %s26_s14 }
   0x2   :  { %s28_s16 = sshll.u32 %s156_s15, 4  ;;  %s15_s19 = sshll.u32 %s191_s0, 4  ;;  %s29_s16 = int_to_ptr.vmem [resolvable:$true] %s28_s16  ;;  %s16_s19 = int_to_ptr.hbm [resolvable:$true] %s15_s19 }
   0x3   :  { %31 = dma.hbm_to_vmem [thread:$0]  %s27_s14, 128, %s29_s16, [#allocation5]  }
   0x4   :  { %s157_s20 = smov [#allocation2]   ;;  %s37_s24 = sshll.u32 %s193_s2, 4  ;;  %s38_s24 = int_to_ptr.hbm [resolvable:$true] %s37_s24 }
   0x5   :  { %s17_s21 = sshll.u32 %s157_s20, 4  ;;  %s158_s1 = smov [#allocation6]   ;;  %s18_s21 = int_to_ptr.vmem [resolvable:$true] %s17_s21 }
   0x6   :  { %20 = dma.hbm_to_vmem [thread:$0]  %s16_s19, 128, %s18_s21, [#allocation3]  }
   0x7   :  { %s39_s25 = sshll.u32 %s158_s1, 4  ;;  %s40_s25 = int_to_ptr.vmem [resolvable:$true] %s39_s25 }
   0x8   :  { %42 = dma.hbm_to_vmem [thread:$0]  %s38_s24, 128, %s40_s25, [#allocation5]  }
   0x9   :  { %152 = dma.done.wait [#allocation3], 128  }
   0xa   :  { %153 = vsyncadd [#allocation3], 4294967168 }
   0xb   :  { %154 = dma.done.wait [#allocation5], 256  }
   0xc   :  { %155 = vsyncadd [#allocation5], 4294967040  ;;  %v55_v0 = vld [vmem:[#allocation2] sm:$0xff]  ;;  %v56_v1 = vld [vmem:[#allocation4] sm:$0xff]  ;;  %vm63_vm0 = vcmask 261120   ;;  %vm69_vm1 = vcmask 7168  }
   0xd   :  { %v57_v2 = vld [vmem:[#allocation6] sm:$0xff]  ;;  %v58_v3 = vsub.f32 %v55_v0, %v56_v1 }
   0xe   :  { %v60_v4 = vsub.f32 %v55_v0, %v57_v2 }
   0xf   :  { %v59_v5 = vmul.f32 %v58_v3, %v58_v3 }
  0x10   :  { %v61_v6 = vmul.f32 %v60_v4, %v60_v4 }
  0x12   :  { %v62_v7 = vsub.f32 %v59_v5, %v61_v6 }
  0x14   :  { %v64_v8 = vsel %vm63_vm0, %v62_v7, 0.0 }
  0x15   :  { %65 = vadd.xlane.f32.xlu0 %v64_v8 }
  0x88   :  { %v66_v9 = vpop.xlane.xlu0 %65 }
  0x89   :  { %v67_v10 = vadd.f32 0.2, %v66_v9 }
  0x8b   :  { %v68_v11 = vmax.f32 %v67_v10, 0.0 }
  0x8d   :  { %70 = vst.msk [vmem:[%s194_s3] sm:$0xff] %vm69_vm1, %v68_v11 }
  0x8e   :  { %75 = vsyncpa [#allocation3], 1 }
  0x8f   :  { %76 = vsyncpa [#allocation5], 1 }

</bundles_post_ra>
